<compile_context>
chip_gen: v6e
topology: v6e:2x2x1
jax: 0.10.0
libtpu: 0.0.40
codegen_flags: <defaults>
</compile_context>

<pallas_src>
import functools

import jax
import jax.numpy as jnp
from jax.experimental import pallas as pl
from jax.experimental.pallas import tpu as pltpu

_SUBLANES = 8
_LANES = 128


def _cdiv(a, b):
    return (a + b - 1) // b


def _round_up(x, m):
    return _cdiv(x, m) * m


def _chip_block_config():
    """Return (target block bytes, hardware TensorCore splits) for this chip."""
    try:
        kind = jax.devices()[0].device_kind.lower()
    except Exception:
        kind = ""
    if "v7" in kind:
        return 16 << 20, 2              # 2 TC/chip, 3.2 TB/s: big blocks + split
    if "v6" in kind:
        return 8 << 20, 1               # single TC
    if "v5" in kind and ("lite" in kind or "v5e" in kind):
        return 4 << 20, 1               # v5e: stay inside 16 MiB scoped VMEM
    if "v5" in kind or "v4" in kind:
        return 8 << 20, 2               # v5p / v4 megacore (2 TCs)
    return 4 << 20, 1                   # unknown: conservative


def _magnitude_loss_kernel(w_ref, o_ref, *, n_full_rows, block_rows,
                           blocks_per_split, use_square):
    c = pl.program_id(0)                # split (sharded across TCs when >1)
    i = pl.program_id(1)                # reduction step within this split

    # Output block is resident across the reduction axis -> accumulator.
    @pl.when(i == 0)
    def _():
        o_ref[...] = jnp.zeros_like(o_ref)

    x = w_ref[...].astype(jnp.float32)  # native dtype in HBM, cast in-kernel
    mag = x * x if use_square else jnp.abs(x)

    blk = c * blocks_per_split + i      # logical (unclamped) block index
    row0 = blk * block_rows             # first logical row of this block
    # Row-unit compare: no int32 overflow even for multi-billion-element inputs.
    fully_valid = row0 + block_rows <= n_full_rows

    @pl.when(fully_valid)
    def _():
        # Pure-VPU partial reduction down to one (8, 128) vreg tile.
        o_ref[...] += jnp.sum(mag.reshape(-1, _SUBLANES, _LANES), axis=0)

    @pl.when(jnp.logical_not(fully_valid))
    def _():
        # Boundary (or fully out-of-range / clamped duplicate) block: mask rows.
        rows = jax.lax.broadcasted_iota(jnp.int32, mag.shape, 0) + row0
        masked = jnp.where(rows < n_full_rows, mag, 0.0)
        o_ref[...] += jnp.sum(masked.reshape(-1, _SUBLANES, _LANES), axis=0)


def magnitude_loss(w, loss="mse", *, min_pallas_elems=1 << 16,
                   block_rows_cap=None):
    """Pallas equivalent of MagnitudeLoss(nn.MSELoss()/nn.L1Loss())(w)."""
    assert loss in ("mse", "l1")
    use_square = (loss == "mse")
    n_elems = int(w.size)
    assert n_elems > 0

    n_full_rows = n_elems // _LANES

    # Small-input fast path: a kernel launch + masked epilogue would dominate.
    if n_elems <= min_pallas_elems or n_full_rows == 0:
        x = w.astype(jnp.float32)
        return jnp.mean(x * x) if use_square else jnp.mean(jnp.abs(x))

    flat = jnp.ravel(w)                       # contiguous reshape: no HBM copy
    tail = n_elems - n_full_rows * _LANES

    if tail:
        # Kernel consumes only the 128-aligned prefix; tiny tail in epilogue.
        # TODO(synk): the prefix slice may still copy; avoid with a manual-DMA
        #             (memory_space=pl.ANY) exact-length pl.ds tail path.
        body = flat[: n_full_rows * _LANES]
        t = flat[n_full_rows * _LANES:].astype(jnp.float32)
        tail_sum = jnp.sum(t * t) if use_square else jnp.sum(jnp.abs(t))
    else:
        body = flat
        tail_sum = jnp.float32(0.0)

    x2d = body.reshape(n_full_rows, _LANES)

    # Size blocks in bytes (constant DMA size across dtypes), rounded to the
    # dtype-specific sublane multiple so the block never violates the min tile.
    itemsize = jnp.dtype(w.dtype).itemsize
    sublane_mult = _SUBLANES * max(1, 4 // max(1, itemsize))   # 8/16/32
    target_bytes, hw_splits = _chip_block_config()
    target_rows = max(sublane_mult,
                      _round_up(target_bytes // (_LANES * itemsize),
                                sublane_mult))
    if block_rows_cap is not None:
        target_rows = min(target_rows, _round_up(block_rows_cap, sublane_mult))
    block_rows = min(target_rows, _round_up(n_full_rows, sublane_mult))

    n_blocks = _cdiv(n_full_rows, block_rows)
    num_splits = hw_splits if n_blocks >= 2 else 1
    blocks_per_split = _cdiv(n_blocks, num_splits)

    block_bytes = block_rows * _LANES * itemsize
    vmem_limit = max(16 << 20, 2 * block_bytes + (4 << 20))

    kernel = functools.partial(
        _magnitude_loss_kernel,
        n_full_rows=n_full_rows,
        block_rows=block_rows,
        blocks_per_split=blocks_per_split,
        use_square=use_square,
    )

    def in_map(c, i):
        # Clamp so an over-shot final step of a split re-reads a valid block;
        # its contribution is masked to zero inside the kernel.  With exact
        # (even) splits the min is a no-op.
        return (jnp.minimum(c * blocks_per_split + i, n_blocks - 1), 0)

    dim_sem = (("parallel", "arbitrary") if num_splits > 1
               else ("arbitrary", "arbitrary"))

    partials = pl.pallas_call(
        kernel,
        out_shape=jax.ShapeDtypeStruct(
            (num_splits * _SUBLANES, _LANES), jnp.float32),
        grid_spec=pltpu.PrefetchScalarGridSpec(
            num_scalar_prefetch=0,
            grid=(num_splits, blocks_per_split),
            in_specs=[pl.BlockSpec((block_rows, _LANES), in_map)],
            out_specs=pl.BlockSpec((_SUBLANES, _LANES), lambda c, i: (c, 0)),
        ),
        compiler_params=pltpu.CompilerParams(
            dimension_semantics=dim_sem,
            vmem_limit_bytes=int(vmem_limit),
        ),
    )(x2d)

    # Tiny epilogue: (num_splits*8*128) partial sums + ragged tail -> mean.
    total = jnp.sum(partials) + tail_sum
    return total * jnp.float32(1.0 / n_elems)


if __name__ == "__main__":
    key = jax.random.PRNGKey(0)
    k1, k2, k3 = jax.random.split(key, 3)

    # Small NCHW tensor consistent with the module (e.g. a flow / feature map).
    w = jax.random.normal(k1, (2, 4, 16, 16), dtype=jnp.float32)
    ref_mse = jnp.mean(w * w)
    ref_l1 = jnp.mean(jnp.abs(w))

    # Fast path (default threshold) and forced Pallas path must both match.
    fast_mse = jax.block_until_ready(magnitude_loss(w, loss="mse"))
    pl_mse = jax.block_until_ready(
        magnitude_loss(w, loss="mse", min_pallas_elems=0))
    pl_l1 = jax.block_until_ready(
        magnitude_loss(w, loss="l1", min_pallas_elems=0))
    assert jnp.allclose(fast_mse, ref_mse, rtol=1e-5, atol=1e-6)
    assert jnp.allclose(pl_mse, ref_mse, rtol=1e-5, atol=1e-6)
    assert jnp.allclose(pl_l1, ref_l1, rtol=1e-5, atol=1e-6)

    # Ragged (numel % 128 != 0) bf16 input: streamed in native dtype, boundary
    # block masked in-kernel, <128-element tail reduced in the epilogue.
    w_bf16 = jax.random.normal(k2, (3, 5, 47, 33),
                               dtype=jnp.float32).astype(jnp.bfloat16)
    got_bf16 = jax.block_until_ready(
        magnitude_loss(w_bf16, loss="mse", min_pallas_elems=0))
    ref_bf16 = jnp.mean(jnp.square(w_bf16.astype(jnp.float32)))
    assert jnp.allclose(got_bf16, ref_bf16, rtol=1e-5, atol=1e-6)

    # Larger aligned input with a capped block size so the multi-block
    # accumulation (and the 2-TC split on v7x) path is exercised.
    w_big = jax.random.normal(k3, (64, 4, 64, 64), dtype=jnp.float32)
    got_big = jax.block_until_ready(
        magnitude_loss(w_big, loss="l1", min_pallas_elems=0,
                       block_rows_cap=512))
    ref_big = jnp.mean(jnp.abs(w_big))
    assert jnp.allclose(got_big, ref_big, rtol=1e-5, atol=1e-6)

    print("KERNEL_OK")
</pallas_src>

<mosaic_0001>
module attributes {stable_mosaic.version = 11 : i64} {
  func.func @_magnitude_loss_kernel(%arg0: i32, %arg1: i32, %arg2: memref<16x128xf32, #tpu.memory_space<vmem>>, %arg3: memref<8x128xf32, #tpu.memory_space<vmem>>) attributes {dimension_semantics = [#tpu.dimension_semantics<arbitrary>, #tpu.dimension_semantics<arbitrary>], iteration_bounds = array<i64: 1, 1>, scalar_prefetch = 0 : i64, scratch_operands = 0 : i64, tpu.core_type = #tpu.core_type<tc>, window_params = [{transform_indices = @transform_0, window_bounds = array<i64: 16, 128>}, {transform_indices = @transform_1, window_bounds = array<i64: 8, 128>}]} {
    %c0_i32 = arith.constant 0 : i32
    %0 = arith.cmpi eq, %arg1, %c0_i32 : i32
    %1 = arith.extui %0 : i1 to i32
    %c0_i32_0 = arith.constant 0 : i32
    %2 = arith.cmpi ne, %1, %c0_i32_0 : i32
    scf.if %2 {
      %cst = arith.constant 0.000000e+00 : f32
      %15 = vector.broadcast %cst : f32 to vector<8x128xf32>
      %c0_6 = arith.constant 0 : index
      %c0_7 = arith.constant 0 : index
      %16 = vector.load %arg3[%c0_6, %c0_7] : memref<8x128xf32, #tpu.memory_space<vmem>>, vector<8x128xf32>
      tpu.vector_store %arg3[%c0_6, %c0_7], %15 {strides = array<i32>} : memref<8x128xf32, #tpu.memory_space<vmem>>, vector<8x128xf32>,
    } else {
    }
    %c0 = arith.constant 0 : index
    %c0_1 = arith.constant 0 : index
    %3 = vector.load %arg2[%c0, %c0_1] : memref<16x128xf32, #tpu.memory_space<vmem>>, vector<16x128xf32>
    %4 = arith.mulf %3, %3 : vector<16x128xf32>
    %c1_i32 = arith.constant 1 : i32
    %5 = arith.muli %arg0, %c1_i32 : i32
    %6 = arith.addi %5, %arg1 : i32
    %c16_i32 = arith.constant 16 : i32
    %7 = arith.muli %6, %c16_i32 : i32
    %c16_i32_2 = arith.constant 16 : i32
    %8 = arith.addi %7, %c16_i32_2 : i32
    %c16_i32_3 = arith.constant 16 : i32
    %9 = arith.cmpi sle, %8, %c16_i32_3 : i32
    %10 = arith.extui %9 : i1 to i32
    %c0_i32_4 = arith.constant 0 : i32
    %11 = arith.cmpi ne, %10, %c0_i32_4 : i32
    scf.if %11 {
      %c0_6 = arith.constant 0 : index
      %c0_7 = arith.constant 0 : index
      %15 = vector.load %arg3[%c0_6, %c0_7] : memref<8x128xf32, #tpu.memory_space<vmem>>, vector<8x128xf32>
      %16 = vector.shape_cast %4 : vector<16x128xf32> to vector<2x8x128xf32>
      %cst = arith.constant dense<0.000000e+00> : vector<8x128xf32>
      %17 = vector.multi_reduction <add>, %16, %cst [0] : vector<2x8x128xf32> to vector<8x128xf32>
      %18 = arith.addf %15, %17 : vector<8x128xf32>
      %c0_8 = arith.constant 0 : index
      %c0_9 = arith.constant 0 : index
      %19 = vector.load %arg3[%c0_8, %c0_9] : memref<8x128xf32, #tpu.memory_space<vmem>>, vector<8x128xf32>
      tpu.vector_store %arg3[%c0_8, %c0_9], %18 {strides = array<i32>} : memref<8x128xf32, #tpu.memory_space<vmem>>, vector<8x128xf32>,
    } else {
    }
    %true = arith.constant true
    %12 = arith.xori %9, %true : i1
    %13 = arith.extui %12 : i1 to i32
    %c0_i32_5 = arith.constant 0 : i32
    %14 = arith.cmpi ne, %13, %c0_i32_5 : i32
    scf.if %14 {
      %15 = tpu.iota {dimensions = array<i32: 0>} : vector<16x128xi32>
      %16 = vector.broadcast %7 : i32 to vector<16x128xi32>
      %17 = arith.addi %15, %16 : vector<16x128xi32>
      %c16_i32_6 = arith.constant 16 : i32
      %18 = vector.broadcast %c16_i32_6 : i32 to vector<16x128xi32>
      %19 = arith.cmpi slt, %17, %18 : vector<16x128xi32>
      %cst = arith.constant 0.000000e+00 : f32
      %20 = vector.broadcast %cst : f32 to vector<16x128xf32>
      %21 = arith.select %19, %4, %20 : vector<16x128xi1>, vector<16x128xf32>
      %c0_7 = arith.constant 0 : index
      %c0_8 = arith.constant 0 : index
      %22 = vector.load %arg3[%c0_7, %c0_8] : memref<8x128xf32, #tpu.memory_space<vmem>>, vector<8x128xf32>
      %23 = vector.shape_cast %21 : vector<16x128xf32> to vector<2x8x128xf32>
      %cst_9 = arith.constant dense<0.000000e+00> : vector<8x128xf32>
      %24 = vector.multi_reduction <add>, %23, %cst_9 [0] : vector<2x8x128xf32> to vector<8x128xf32>
      %25 = arith.addf %22, %24 : vector<8x128xf32>
      %c0_10 = arith.constant 0 : index
      %c0_11 = arith.constant 0 : index
      %26 = vector.load %arg3[%c0_10, %c0_11] : memref<8x128xf32, #tpu.memory_space<vmem>>, vector<8x128xf32>
      tpu.vector_store %arg3[%c0_10, %c0_11], %25 {strides = array<i32>} : memref<8x128xf32, #tpu.memory_space<vmem>>, vector<8x128xf32>,
    } else {
    }
    return
  }
  func.func @transform_0(%arg0: i32, %arg1: i32) -> (i32, i32) {
    %c1_i32 = arith.constant 1 : i32
    %0 = arith.muli %arg0, %c1_i32 : i32
    %1 = arith.addi %0, %arg1 : i32
    %c0_i32 = arith.constant 0 : i32
    %2 = arith.minsi %1, %c0_i32 : i32
    %c0_i32_0 = arith.constant 0 : i32
    %c0_i32_1 = arith.constant 0 : i32
    return %2, %c0_i32_0 : i32, i32
  }
  func.func @transform_1(%arg0: i32, %arg1: i32) -> (i32, i32) {
    %c0_i32 = arith.constant 0 : i32
    %c0_i32_0 = arith.constant 0 : i32
    return %arg0, %c0_i32 : i32, i32
  }
}

</mosaic_0001>

<bundles_post_ra>
// kernel: tpu_custom_call.1
= control target key start
LH: loop header
LB: loop body
LE: loop exit
PB: predicated region body
PF: predicated region fallthrough
CT: control target
= control target key end

     0   :  { %6 = vsyncpa [#allocation3], 0  ;;  %s157_s0 = inlined_call_operand.hbm [shape: f32[16,128], index: 0, kind: input, shape index: {}]   ;;  %s158_s1 = inlined_call_operand.hbm [shape: f32[8,128], index: 1, kind: output, shape index: {}]  }
   0x1   :  { %7 = vsyncpa [#allocation4], 0  ;;  %s137_s6 = smov [#allocation2]  }
   0x2   :  { %s19_s7 = sshll.u32 %s137_s6, 4  ;;  %s20_s7 = int_to_ptr.vmem [resolvable:$true] %s19_s7 }
   0x3   :  { %s101_s8 = scalar_lea.vmem %s20_s7, 256  ;;  %p106_p1 = scmp.lt.s32.totalorder %s20_s7, %s20_s7 }
   0x4   :  { %p102_p0 = scmp.ne.s32.totalorder %s20_s7, %s101_s8  ;;  %p107_p2 = scmp.lt.s32.totalorder %s101_s8, %s101_s8 }
   0x6   :  { %p108_p3 = por %p107_p2, %p106_p1 }
   0x8   :  { %p109_p4 = pnand %p108_p3, %p102_p0 }
   0xa   :  { %112 = shalt.err (!%p109_p4)
}
   0xb   :  { %s138_s9 = smov 128   ;;  %s139_s10 = smov 8  }
   0xc   :  { %25 = dma.hbm_to_vmem [thread:$0]  %s157_s0, 256, %s20_s7, [#allocation3], %s138_s9, %s138_s9, %s139_s10  }
   0xd   :  { %133 = dma.done.wait [#allocation3], 256  }
   0xe   :  { %134 = vsyncadd [#allocation3], 4294967040  ;;  %v38_v0 = vld [vmem:[#allocation2] sm:$0xff]  ;;  %v39_v1 = vld [vmem:[#allocation2 + $0x8] sm:$0xff]  ;;  %s140_s13 = smov [#allocation5]  }
   0xf   :  { %v40_v2 = vmul.f32 %v38_v0, %v38_v0  ;;  %v41_v3 = vmul.f32 %v39_v1, %v39_v1  ;;  %s77_s14 = sshll.u32 %s140_s13, 4  ;;  %s78_s14 = int_to_ptr.vmem [resolvable:$true] %s77_s14 }
  0x10   :  { %s113_s15 = scalar_lea.vmem %s78_s14, 128  ;;  %p118_p6 = scmp.lt.s32.totalorder %s78_s14, %s78_s14 }
  0x11   :  { %v50_v4 = vadd.f32 %v41_v3, %v40_v2  ;;  %p114_p5 = scmp.ne.s32.totalorder %s78_s14, %s113_s15  ;;  %p119_p7 = scmp.lt.s32.totalorder %s113_s15, %s113_s15 }
  0x13   :  { %52 = vst [vmem:[#allocation5] sm:$0xff] %v50_v4  ;;  %p120_p8 = por %p119_p7, %p118_p6 }
  0x15   :  { %p121_p9 = pnand %p120_p8, %p114_p5 }
  0x17   :  { %124 = shalt.err (!%p121_p9)
}
  0x18   :  { %80 = dma.vmem_to_hbm [thread:$0]  %s78_s14, 128, %s158_s1, [#allocation4]  }
  0x19   :  { %135 = dma.done.wait [#allocation4], 128  }
  0x1a   :  { %136 = vsyncadd [#allocation4], 4294967168 }
  0x1b   :  { %84 = vsyncpa [#allocation3], 1 }
  0x1c   :  { %85 = vsyncpa [#allocation4], 1 }

</bundles_post_ra>
